<compile_context>
chip_gen: v5e
topology: v5e:2x2
jax: 0.10.0
libtpu: 0.0.40
codegen_flags: <defaults>
</compile_context>

<pallas_src>
import functools

import numpy as np
import jax
import jax.numpy as jnp
from jax import lax
from jax.experimental import pallas as pl
from jax.experimental.pallas import tpu as pltpu

LANE = 128
SUBLANE = 8
ROW_TILE = 64  # readout rows per grid step (amortises ~0.35us/step launch overhead)


def _round_up(x, m):
    return (x + m - 1) // m * m


def _vmem_limit_bytes():
    """Generation-aware VMEM budget (v5e/v6e: 128 MiB physical, v7x: 64 MiB)."""
    try:
        cap = int(pltpu.get_tpu_info().vmem_capacity_bytes)
    except Exception:  # fall back to a conservative default if the query is unavailable
        cap = 64 * 1024 * 1024
    return max(32 * 1024 * 1024, int(cap * 0.8))


def mp_kernel(f_atoms_ref, f_bonds_ref, W_i_ref, W_h_ref, W_o_atom_ref, W_o_msg_ref,
              b_o_ref, a2b_ref, b2a_ref,
              atom_hiddens_ref,
              msg_ref, amsg_ref, gath_ref,
              *, depth, max_nb, inv_max_nb):
    """Directed bond message passing + W_o projection (atom_messages=False).

    Index arrays (a2b flattened, b2a) sit in SMEM; gather/scatter are dynamic row loads/stores
    instead of one-hot matmuls.  Padding a2b slots / padded bonds point at bond row 0, which is
    all-zero through every iteration (f_bonds[0] == 0, bias-free W_i/W_h).
    """
    nb_p, h_p = msg_ref.shape
    na_p = amsg_ref.shape[0]

    W_h = W_h_ref[...]

    # input = W_i(f_bonds) (bias=False); message = ReLU(input).  Row 0 / padded rows stay 0.
    inp = jnp.dot(f_bonds_ref[...], W_i_ref[...], preferred_element_type=jnp.float32)
    msg_ref[...] = jnp.maximum(inp, jnp.float32(0.0))

    # Reverse-bond pair swizzle (chemprop layout: b2revb swaps 2k+1 <-> 2k+2), hoisted mask.
    parity_odd = (lax.broadcasted_iota(jnp.int32, (nb_p, h_p), 0) % 2) == 1

    def reverse_swizzle(message):
        down = jnp.roll(message, 1, axis=0)    # down[i] = message[i-1] (row 0 wraps to zero pad)
        up = jnp.roll(message, -1, axis=0)     # up[i]   = message[i+1] (last row wraps to row 0)
        return jnp.where(parity_odd, up, down)

    def neighbour_sum():
        # a_message[a] = sum_j message[a2b[a, j]]   (padding slots -> always-zero bond row 0)
        @pl.loop(0, na_p)
        def _(a):
            base = a * max_nb
            acc = msg_ref[pl.ds(a2b_ref[base], 1), :]
            for j in range(1, max_nb):
                acc = acc + msg_ref[pl.ds(a2b_ref[base + j], 1), :]
            amsg_ref[pl.ds(a, 1), :] = acc

    for _ in range(depth - 1):
        message = msg_ref[...]
        rev = reverse_swizzle(message)              # message[b2revb], vectorised (XLU + VPU)
        neighbour_sum()

        # gathered[b] = a_message[b2a[b]]  (true f32 row gather, no bf16 double rounding)
        @pl.loop(0, nb_p)
        def _(b):
            gath_ref[pl.ds(b, 1), :] = amsg_ref[pl.ds(b2a_ref[b], 1), :]

        pre = gath_ref[...] - rev
        # message = ReLU(input + W_h(message)); dropout is identity at inference.
        msg_ref[...] = jnp.maximum(
            inp + jnp.dot(pre.astype(jnp.bfloat16), W_h, preferred_element_type=jnp.float32),
            jnp.float32(0.0))

    # readout aggregation: nei_a_message.mean(dim=1) -> divide by padded slot count.
    neighbour_sum()
    a_message = amsg_ref[...] * jnp.float32(inv_max_nb)
    # atom_hiddens = ReLU(W_o([f_atoms, a_message]) + b_o)  (concat done as a split matmul)
    atom_hiddens_ref[...] = jnp.maximum(
        jnp.dot(f_atoms_ref[...], W_o_atom_ref[...], preferred_element_type=jnp.float32)
        + jnp.dot(a_message.astype(jnp.bfloat16), W_o_msg_ref[...],
                  preferred_element_type=jnp.float32)
        + b_o_ref[...],
        jnp.float32(0.0))


def readout_kernel(tbl_ref, ah_ref, out_ref, *, row_tile, l_max):
    """AdaptiveMaxPool1d over contiguous per-molecule atom windows.

    tbl (SMEM, scalar-prefetched, flat [rows * 3]) holds (slab_start, lo, hi) per output row:
    the window atoms are slab rows lo..hi-1 of atom_hiddens[slab_start : slab_start + l_max].
    One slab load + masked max per row; the row tile is written with a single full-tile store.
    """
    base = pl.program_id(0) * row_tile
    h_p = ah_ref.shape[1]
    ridx = lax.broadcasted_iota(jnp.int32, (l_max, h_p), 0)   # hoisted out of the row loop
    rows = []
    for j in range(row_tile):
        r = base + j
        slab_start = tbl_ref[3 * r]
        lo = tbl_ref[3 * r + 1]
        hi = tbl_ref[3 * r + 2]
        slab = ah_ref[pl.ds(slab_start, l_max), :]            # [l_max, H] contiguous slab
        valid = (ridx >= lo) & (ridx < hi)
        rows.append(jnp.max(jnp.where(valid, slab, jnp.float32(-jnp.inf)),
                            axis=0, keepdims=True))           # [1, H]
    out_ref[...] = jnp.concatenate(rows, axis=0)               # one unmasked (row_tile, H) store


def mpn_encoder_forward(f_atoms, f_bonds, a2b, b2a, b2revb, a_scope, params, depth):
    f_atoms = np.asarray(f_atoms, np.float32)
    f_bonds = np.asarray(f_bonds, np.float32)
    a2b = np.asarray(a2b, np.int64)
    b2a = np.asarray(b2a, np.int64)
    b2revb = np.asarray(b2revb, np.int64)

    n_atoms, atom_fdim = f_atoms.shape
    n_bonds, bond_fdim = f_bonds.shape
    max_nb = a2b.shape[1]
    W_i = np.asarray(params["W_i"], np.float32)
    W_h = np.asarray(params["W_h"], np.float32)
    W_o = np.asarray(params["W_o"], np.float32)
    b_o = np.asarray(params["b_o"], np.float32)
    hidden = W_i.shape[1]

    # lane/sublane friendly padded sizes
    H_p = _round_up(hidden, LANE)
    AF_p = _round_up(atom_fdim, LANE)
    BF_p = _round_up(bond_fdim, LANE)
    NA_p = _round_up(n_atoms, SUBLANE)
    NB_p = _round_up(n_bonds + 1, SUBLANE)  # >= 1 trailing zero bond row for the pair swizzle

    # chemprop builds directed bonds in reverse pairs; the in-kernel pair swizzle relies on it.
    assert n_bonds % 2 == 1, "chemprop bond layout: padding bond 0 + directed bond pairs"
    expected_rev = np.zeros(n_bonds, np.int64)
    expected_rev[1::2] = np.arange(1, n_bonds, 2) + 1
    expected_rev[2::2] = np.arange(2, n_bonds, 2) - 1
    assert np.array_equal(b2revb, expected_rev), \
        "b2revb must follow chemprop's reverse-bond pair layout"

    def pad2(x, rows, cols, dtype):
        out = np.zeros((rows, cols), np.float32)
        out[: x.shape[0], : x.shape[1]] = x
        return jnp.asarray(out, dtype)

    # integer graph structure -> SMEM (padding slots / padded bonds point at zero row 0)
    a2b_flat = np.zeros((NA_p * max_nb,), np.int32)
    a2b_flat[: n_atoms * max_nb] = a2b.reshape(-1).astype(np.int32)
    b2a_pad = np.zeros((NB_p,), np.int32)
    b2a_pad[:n_bonds] = b2a.astype(np.int32)

    inputs = (
        pad2(f_atoms, NA_p, AF_p, jnp.bfloat16),
        pad2(f_bonds, NB_p, BF_p, jnp.bfloat16),
        pad2(W_i, BF_p, H_p, jnp.bfloat16),
        pad2(W_h, H_p, H_p, jnp.bfloat16),
        pad2(W_o[:atom_fdim], AF_p, H_p, jnp.bfloat16),
        pad2(W_o[atom_fdim:], H_p, H_p, jnp.bfloat16),
        pad2(b_o[None, :], 1, H_p, jnp.float32),
        jnp.asarray(a2b_flat),
        jnp.asarray(b2a_pad),
    )

    vmem_limit = _vmem_limit_bytes()
    mp_flops = (2 * NB_p * BF_p * H_p + (depth - 1) * 2 * NB_p * H_p * H_p
                + 2 * NA_p * AF_p * H_p + 2 * NA_p * H_p * H_p)
    mp_bytes = sum(int(np.prod(a.shape)) * a.dtype.itemsize for a in inputs) + NA_p * H_p * 4

    # TODO(synk): production-scale batches (NB ~ 5k, H ~ 384) additionally want the bond axis
    # tiled with a grid (DMA/MXU overlap, scales past VMEM) and the message passing split
    # across both v7x TensorCores with a CMEM a_message reduction.
    atom_hiddens = pl.pallas_call(
        functools.partial(mp_kernel, depth=depth, max_nb=max_nb, inv_max_nb=1.0 / max_nb),
        out_shape=jax.ShapeDtypeStruct((NA_p, H_p), jnp.float32),
        in_specs=(
            [pl.BlockSpec(memory_space=pltpu.MemorySpace.VMEM)] * 7
            + [pl.BlockSpec(memory_space=pltpu.MemorySpace.SMEM)] * 2),
        out_specs=pl.BlockSpec(memory_space=pltpu.MemorySpace.VMEM),
        scratch_shapes=[
            pltpu.VMEM((NB_p, H_p), jnp.float32),   # message
            pltpu.VMEM((NA_p, H_p), jnp.float32),   # a_message
            pltpu.VMEM((NB_p, H_p), jnp.float32),   # gathered a_message[b2a]
        ],
        cost_estimate=pl.CostEstimate(flops=int(mp_flops), transcendentals=0,
                                      bytes_accessed=int(mp_bytes)),
        compiler_params=pltpu.CompilerParams(vmem_limit_bytes=vmem_limit),
    )(*inputs)

    # ---- AdaptiveMaxPool1d readout over contiguous per-molecule atom windows ----
    n_mols = len(a_scope)
    sizes = [int(s) for _, s in a_scope]
    max_node = max([s for s in sizes if s > 0], default=1)
    n_rows = n_mols * max_node
    R_p = _round_up(n_rows, ROW_TILE)

    windows = []  # (start_atom_row, length) per output row, row-major over [mol, node]
    for a_start, a_size in a_scope:
        a_start, a_size = int(a_start), int(a_size)
        for i in range(max_node):
            if a_size == 0:
                # cached_zero_vector branch: value irrelevant, rows zeroed after the kernel.
                windows.append((0, 1))
            else:
                s = (i * a_size) // max_node
                e = ((i + 1) * a_size + max_node - 1) // max_node
                windows.append((a_start + s, e - s))
    l_max = max(length for _, length in windows)

    tbl = np.zeros((R_p, 3), np.int32)
    tbl[:, 2] = 1                                  # padded rows: slab_start=0, lo=0, hi=1
    for r, (start, length) in enumerate(windows):
        slab_start = max(0, min(start, NA_p - l_max))   # keep the slab load in-bounds
        lo = start - slab_start
        tbl[r] = (slab_start, lo, lo + length)
    tbl_flat = jnp.asarray(tbl.reshape(-1))

    ro_bytes = NA_p * H_p * 4 + R_p * H_p * 4 + R_p * 3 * 4
    pooled = pl.pallas_call(
        functools.partial(readout_kernel, row_tile=ROW_TILE, l_max=l_max),
        out_shape=jax.ShapeDtypeStruct((R_p, H_p), jnp.float32),
        grid_spec=pltpu.PrefetchScalarGridSpec(
            num_scalar_prefetch=1,
            grid=(R_p // ROW_TILE,),
            # grid-invariant atom_hiddens: whole-ref VMEM (single buffer, no per-step DMA)
            in_specs=[pl.BlockSpec(memory_space=pltpu.MemorySpace.VMEM)],
            out_specs=pl.BlockSpec((ROW_TILE, H_p), lambda r, idx: (r, 0)),
        ),
        cost_estimate=pl.CostEstimate(flops=int(R_p * l_max * H_p), transcendentals=0,
                                      bytes_accessed=int(ro_bytes)),
        compiler_params=pltpu.CompilerParams(
            dimension_semantics=("parallel",),
            vmem_limit_bytes=vmem_limit),
    )(tbl_flat, atom_hiddens)

    out = pooled[:n_rows, :hidden].reshape(n_mols, max_node, hidden)
    # a_size == 0 molecules map to the cached (all-zero) vector.
    zero_mask = jnp.asarray([1.0 if s > 0 else 0.0 for s in sizes],
                            jnp.float32).reshape(n_mols, 1, 1)
    return out * zero_mask


def _reference(f_atoms, f_bonds, a2b, b2a, b2revb, a_scope, params, depth):
    """Pure-JAX f32 re-implementation of the PyTorch forward (numeric smoke test)."""
    f_atoms = jnp.asarray(f_atoms, jnp.float32)
    f_bonds = jnp.asarray(f_bonds, jnp.float32)
    inp = f_bonds @ params["W_i"]
    msg = jnp.maximum(inp, 0.0)
    for _ in range(depth - 1):
        a_msg = msg[a2b].sum(axis=1)
        rev = msg[b2revb]
        msg = jnp.maximum(inp + (a_msg[b2a] - rev) @ params["W_h"], 0.0)
    a_msg = msg[a2b].mean(axis=1)
    ah = jnp.maximum(jnp.concatenate([f_atoms, a_msg], axis=1) @ params["W_o"] + params["b_o"],
                     0.0)
    max_node = max(s for _, s in a_scope)
    mols = []
    for a_start, a_size in a_scope:
        rows = []
        for i in range(max_node):
            s = (i * a_size) // max_node
            e = ((i + 1) * a_size + max_node - 1) // max_node
            rows.append(ah[a_start + s:a_start + e].max(axis=0))
        mols.append(jnp.stack(rows))
    return jnp.stack(mols)


if __name__ == "__main__":
    key = jax.random.PRNGKey(0)
    atom_fdim, bond_fdim, hidden, depth = 16, 24, 32, 3

    # Synthetic BatchMolGraph (chemprop conventions: index 0 is the zero-padding atom/bond).
    #   molecule 1: atoms 1-3 (path 1-2-3), directed bonds 1..4
    #   molecule 2: atoms 4-7 (ring 4-5-6-7-4), directed bonds 5..12
    n_atoms, n_bonds = 8, 13
    a2b = np.array([[0, 0],
                    [2, 0],
                    [1, 4],
                    [3, 0],
                    [6, 11],
                    [5, 8],
                    [7, 10],
                    [9, 12]], np.int32)
    b2a = np.array([0, 1, 2, 2, 3, 4, 5, 5, 6, 6, 7, 7, 4], np.int32)
    b2revb = np.array([0, 2, 1, 4, 3, 6, 5, 8, 7, 10, 9, 12, 11], np.int32)
    a_scope = [(1, 3), (4, 4)]

    k1, k2, k3, k4, k5, k6 = jax.random.split(key, 6)
    f_atoms = jax.random.normal(k1, (n_atoms, atom_fdim), jnp.float32).at[0].set(0.0)
    f_bonds = jax.random.normal(k2, (n_bonds, bond_fdim), jnp.float32).at[0].set(0.0)

    params = {
        "W_i": 0.1 * jax.random.normal(k3, (bond_fdim, hidden), jnp.float32),  # bias=False
        "W_h": 0.1 * jax.random.normal(k4, (hidden, hidden), jnp.float32),     # bias=False
        "W_o": 0.1 * jax.random.normal(k5, (atom_fdim + hidden, hidden), jnp.float32),
        "b_o": 0.1 * jax.random.normal(k6, (hidden,), jnp.float32),
    }

    out = mpn_encoder_forward(np.asarray(f_atoms), np.asarray(f_bonds),
                              a2b, b2a, b2revb, a_scope, params, depth)
    out = jax.block_until_ready(out)
    assert out.shape == (2, 4, hidden)

    ref = jax.block_until_ready(
        _reference(np.asarray(f_atoms), np.asarray(f_bonds),
                   jnp.asarray(a2b), jnp.asarray(b2a), jnp.asarray(b2revb),
                   a_scope, params, depth))
    np.testing.assert_allclose(np.asarray(out), np.asarray(ref), rtol=5e-2, atol=5e-2)
    print("KERNEL_OK")
</pallas_src>

<mosaic_0001>
module attributes {stable_mosaic.version = 11 : i64} {
  func.func @mp_kernel(%arg0: memref<8x128xbf16, #tpu.memory_space<vmem>>, %arg1: memref<16x128xbf16, #tpu.memory_space<vmem>>, %arg2: memref<128x128xbf16, #tpu.memory_space<vmem>>, %arg3: memref<128x128xbf16, #tpu.memory_space<vmem>>, %arg4: memref<128x128xbf16, #tpu.memory_space<vmem>>, %arg5: memref<128x128xbf16, #tpu.memory_space<vmem>>, %arg6: memref<1x128xf32, #tpu.memory_space<vmem>>, %arg7: memref<16xi32, #tpu.memory_space<smem>>, %arg8: memref<16xi32, #tpu.memory_space<smem>>, %arg9: memref<8x128xf32, #tpu.memory_space<vmem>>, %arg10: memref<16x128xf32, #tpu.memory_space<vmem>>, %arg11: memref<8x128xf32, #tpu.memory_space<vmem>>, %arg12: memref<16x128xf32, #tpu.memory_space<vmem>>) attributes {dimension_semantics = [], scalar_prefetch = 0 : i64, scratch_operands = 3 : i64, tpu.core_type = #tpu.core_type<tc>} {
    %c0 = arith.constant 0 : index
    %c0_0 = arith.constant 0 : index
    %0 = vector.load %arg3[%c0, %c0_0] : memref<128x128xbf16, #tpu.memory_space<vmem>>, vector<128x128xbf16>
    %c0_1 = arith.constant 0 : index
    %c0_2 = arith.constant 0 : index
    %1 = vector.load %arg1[%c0_1, %c0_2] : memref<16x128xbf16, #tpu.memory_space<vmem>>, vector<16x128xbf16>
    %c0_3 = arith.constant 0 : index
    %c0_4 = arith.constant 0 : index
    %2 = vector.load %arg2[%c0_3, %c0_4] : memref<128x128xbf16, #tpu.memory_space<vmem>>, vector<128x128xbf16>
    %cst = arith.constant dense<0.000000e+00> : vector<16x128xf32>
    %3 = tpu.matmul %1, %2, %cst {dimension_numbers = #tpu.dot_dimension_numbers<[1], [0], [0], [1], [0, 0, 1, 1], [], []>} : vector<16x128xbf16>, vector<128x128xbf16>, vector<16x128xf32> -> vector<16x128xf32>
    %cst_5 = arith.constant 0.000000e+00 : f32
    %4 = vector.broadcast %cst_5 : f32 to vector<16x128xf32>
    %5 = arith.maximumf %3, %4 : vector<16x128xf32>
    %c0_6 = arith.constant 0 : index
    %c0_7 = arith.constant 0 : index
    %6 = vector.load %arg10[%c0_6, %c0_7] : memref<16x128xf32, #tpu.memory_space<vmem>>, vector<16x128xf32>
    tpu.vector_store %arg10[%c0_6, %c0_7], %5 {strides = array<i32>} : memref<16x128xf32, #tpu.memory_space<vmem>>, vector<16x128xf32>,
    %7 = tpu.iota {dimensions = array<i32: 0>} : vector<16x128xi32>
    %c2_i32 = arith.constant 2 : i32
    %c0_i32 = arith.constant 0 : i32
    %8 = arith.cmpi eq, %c2_i32, %c0_i32 : i32
    %c1_i32 = arith.constant 1 : i32
    %9 = arith.select %8, %c1_i32, %c2_i32 : i32
    %10 = vector.broadcast %9 : i32 to vector<16x128xi32>
    %11 = arith.remsi %7, %10 : vector<16x128xi32>
    %c0_i32_8 = arith.constant 0 : i32
    %12 = vector.broadcast %c0_i32_8 : i32 to vector<16x128xi32>
    %13 = arith.cmpi ne, %11, %12 : vector<16x128xi32>
    %c0_i32_9 = arith.constant 0 : i32
    %14 = vector.broadcast %c0_i32_9 : i32 to vector<16x128xi32>
    %15 = arith.cmpi slt, %11, %14 : vector<16x128xi32>
    %c0_i32_10 = arith.constant 0 : i32
    %16 = arith.cmpi slt, %9, %c0_i32_10 : i32
    %17 = vector.broadcast %16 : i1 to vector<16x128xi1>
    %18 = vector.broadcast %17 : vector<16x128xi1> to vector<16x128xi1>
    %19 = arith.xori %15, %18 : vector<16x128xi1>
    %20 = arith.andi %19, %13 : vector<16x128xi1>
    %21 = vector.broadcast %9 : i32 to vector<16x128xi32>
    %22 = arith.addi %11, %21 : vector<16x128xi32>
    %23 = arith.select %20, %22, %11 : vector<16x128xi1>, vector<16x128xi32>
    %c1_i32_11 = arith.constant 1 : i32
    %24 = vector.broadcast %c1_i32_11 : i32 to vector<16x128xi32>
    %25 = arith.cmpi eq, %23, %24 : vector<16x128xi32>
    %c0_12 = arith.constant 0 : index
    %c0_13 = arith.constant 0 : index
    %26 = vector.load %arg10[%c0_12, %c0_13] : memref<16x128xf32, #tpu.memory_space<vmem>>, vector<16x128xf32>
    %27 = vector.extract_strided_slice %26 {offsets = [15, 0], sizes = [1, 128], strides = [1, 1]} : vector<16x128xf32> to vector<1x128xf32>
    %28 = vector.extract_strided_slice %26 {offsets = [0, 0], sizes = [15, 128], strides = [1, 1]} : vector<16x128xf32> to vector<15x128xf32>
    %29 = tpu.concatenate %27, %28 in 0 : vector<1x128xf32>, vector<15x128xf32> -> vector<16x128xf32>
    %30 = vector.extract_strided_slice %26 {offsets = [1, 0], sizes = [15, 128], strides = [1, 1]} : vector<16x128xf32> to vector<15x128xf32>
    %31 = vector.extract_strided_slice %26 {offsets = [0, 0], sizes = [1, 128], strides = [1, 1]} : vector<16x128xf32> to vector<1x128xf32>
    %32 = tpu.concatenate %30, %31 in 0 : vector<15x128xf32>, vector<1x128xf32> -> vector<16x128xf32>
    %33 = arith.select %25, %32, %29 : vector<16x128xi1>, vector<16x128xf32>
    %c0_i32_14 = arith.constant 0 : i32
    %c8_i32 = arith.constant 8 : i32
    %34 = arith.addi %c0_i32_14, %c8_i32 : i32
    %c1_i32_15 = arith.constant 1 : i32
    scf.for %arg13 = %c0_i32_14 to %34 step %c1_i32_15  : i32 {
      %c1_i32_62 = arith.constant 1 : i32
      %79 = arith.muli %arg13, %c1_i32_62 : i32
      %c0_i32_63 = arith.constant 0 : i32
      %80 = arith.addi %c0_i32_63, %79 : i32
      %c2_i32_64 = arith.constant 2 : i32
      %81 = arith.muli %80, %c2_i32_64 : i32
      %82 = arith.index_cast %81 : i32 to index
      %83 = memref.load %arg7[%82] : memref<16xi32, #tpu.memory_space<smem>>
      %84 = arith.index_cast %83 : i32 to index
      %c0_65 = arith.constant 0 : index
      %85 = vector.load %arg10[%84, %c0_65] : memref<16x128xf32, #tpu.memory_space<vmem>>, vector<1x128xf32>
      %c1_i32_66 = arith.constant 1 : i32
      %86 = arith.addi %81, %c1_i32_66 : i32
      %87 = arith.index_cast %86 : i32 to index
      %88 = memref.load %arg7[%87] : memref<16xi32, #tpu.memory_space<smem>>
      %89 = arith.index_cast %88 : i32 to index
      %c0_67 = arith.constant 0 : index
      %90 = vector.load %arg10[%89, %c0_67] : memref<16x128xf32, #tpu.memory_space<vmem>>, vector<1x128xf32>
      %91 = arith.addf %85, %90 : vector<1x128xf32>
      %92 = arith.index_cast %80 : i32 to index
      %c0_68 = arith.constant 0 : index
      %93 = vector.load %arg11[%92, %c0_68] : memref<8x128xf32, #tpu.memory_space<vmem>>, vector<1x128xf32>
      tpu.vector_store %arg11[%92, %c0_68], %91 {strides = array<i32>} : memref<8x128xf32, #tpu.memory_space<vmem>>, vector<1x128xf32>,
    }
    %c8_i32_16 = arith.constant 8 : i32
    %c0_i32_17 = arith.constant 0 : i32
    %c16_i32 = arith.constant 16 : i32
    %35 = arith.addi %c0_i32_17, %c16_i32 : i32
    %c1_i32_18 = arith.constant 1 : i32
    scf.for %arg13 = %c0_i32_17 to %35 step %c1_i32_18  : i32 {
      %c1_i32_62 = arith.constant 1 : i32
      %79 = arith.muli %arg13, %c1_i32_62 : i32
      %c0_i32_63 = arith.constant 0 : i32
      %80 = arith.addi %c0_i32_63, %79 : i32
      %81 = arith.index_cast %80 : i32 to index
      %82 = memref.load %arg8[%81] : memref<16xi32, #tpu.memory_space<smem>>
      %83 = arith.index_cast %82 : i32 to index
      %c0_64 = arith.constant 0 : index
      %84 = vector.load %arg11[%83, %c0_64] : memref<8x128xf32, #tpu.memory_space<vmem>>, vector<1x128xf32>
      %85 = arith.index_cast %80 : i32 to index
      %c0_65 = arith.constant 0 : index
      %86 = vector.load %arg12[%85, %c0_65] : memref<16x128xf32, #tpu.memory_space<vmem>>, vector<1x128xf32>
      tpu.vector_store %arg12[%85, %c0_65], %84 {strides = array<i32>} : memref<16x128xf32, #tpu.memory_space<vmem>>, vector<1x128xf32>,
    }
    %c16_i32_19 = arith.constant 16 : i32
    %c0_20 = arith.constant 0 : index
    %c0_21 = arith.constant 0 : index
    %36 = vector.load %arg12[%c0_20, %c0_21] : memref<16x128xf32, #tpu.memory_space<vmem>>, vector<16x128xf32>
    %37 = arith.subf %36, %33 : vector<16x128xf32>
    %38 = arith.truncf %37 : vector<16x128xf32> to vector<16x128xbf16>
    %cst_22 = arith.constant dense<0.000000e+00> : vector<16x128xf32>
    %39 = tpu.matmul %38, %0, %cst_22 {dimension_numbers = #tpu.dot_dimension_numbers<[1], [0], [0], [1], [0, 0, 1, 1], [], []>} : vector<16x128xbf16>, vector<128x128xbf16>, vector<16x128xf32> -> vector<16x128xf32>
    %40 = arith.addf %3, %39 : vector<16x128xf32>
    %cst_23 = arith.constant 0.000000e+00 : f32
    %41 = vector.broadcast %cst_23 : f32 to vector<16x128xf32>
    %42 = arith.maximumf %40, %41 : vector<16x128xf32>
    %c0_24 = arith.constant 0 : index
    %c0_25 = arith.constant 0 : index
    %43 = vector.load %arg10[%c0_24, %c0_25] : memref<16x128xf32, #tpu.memory_space<vmem>>, vector<16x128xf32>
    tpu.vector_store %arg10[%c0_24, %c0_25], %42 {strides = array<i32>} : memref<16x128xf32, #tpu.memory_space<vmem>>, vector<16x128xf32>,
    %c0_26 = arith.constant 0 : index
    %c0_27 = arith.constant 0 : index
    %44 = vector.load %arg10[%c0_26, %c0_27] : memref<16x128xf32, #tpu.memory_space<vmem>>, vector<16x128xf32>
    %45 = vector.extract_strided_slice %44 {offsets = [15, 0], sizes = [1, 128], strides = [1, 1]} : vector<16x128xf32> to vector<1x128xf32>
    %46 = vector.extract_strided_slice %44 {offsets = [0, 0], sizes = [15, 128], strides = [1, 1]} : vector<16x128xf32> to vector<15x128xf32>
    %47 = tpu.concatenate %45, %46 in 0 : vector<1x128xf32>, vector<15x128xf32> -> vector<16x128xf32>
    %48 = vector.extract_strided_slice %44 {offsets = [1, 0], sizes = [15, 128], strides = [1, 1]} : vector<16x128xf32> to vector<15x128xf32>
    %49 = vector.extract_strided_slice %44 {offsets = [0, 0], sizes = [1, 128], strides = [1, 1]} : vector<16x128xf32> to vector<1x128xf32>
    %50 = tpu.concatenate %48, %49 in 0 : vector<15x128xf32>, vector<1x128xf32> -> vector<16x128xf32>
    %51 = arith.select %25, %50, %47 : vector<16x128xi1>, vector<16x128xf32>
    %c0_i32_28 = arith.constant 0 : i32
    %c8_i32_29 = arith.constant 8 : i32
    %52 = arith.addi %c0_i32_28, %c8_i32_29 : i32
    %c1_i32_30 = arith.constant 1 : i32
    scf.for %arg13 = %c0_i32_28 to %52 step %c1_i32_30  : i32 {
      %c1_i32_62 = arith.constant 1 : i32
      %79 = arith.muli %arg13, %c1_i32_62 : i32
      %c0_i32_63 = arith.constant 0 : i32
      %80 = arith.addi %c0_i32_63, %79 : i32
      %c2_i32_64 = arith.constant 2 : i32
      %81 = arith.muli %80, %c2_i32_64 : i32
      %82 = arith.index_cast %81 : i32 to index
      %83 = memref.load %arg7[%82] : memref<16xi32, #tpu.memory_space<smem>>
      %84 = arith.index_cast %83 : i32 to index
      %c0_65 = arith.constant 0 : index
      %85 = vector.load %arg10[%84, %c0_65] : memref<16x128xf32, #tpu.memory_space<vmem>>, vector<1x128xf32>
      %c1_i32_66 = arith.constant 1 : i32
      %86 = arith.addi %81, %c1_i32_66 : i32
      %87 = arith.index_cast %86 : i32 to index
      %88 = memref.load %arg7[%87] : memref<16xi32, #tpu.memory_space<smem>>
      %89 = arith.index_cast %88 : i32 to index
      %c0_67 = arith.constant 0 : index
      %90 = vector.load %arg10[%89, %c0_67] : memref<16x128xf32, #tpu.memory_space<vmem>>, vector<1x128xf32>
      %91 = arith.addf %85, %90 : vector<1x128xf32>
      %92 = arith.index_cast %80 : i32 to index
      %c0_68 = arith.constant 0 : index
      %93 = vector.load %arg11[%92, %c0_68] : memref<8x128xf32, #tpu.memory_space<vmem>>, vector<1x128xf32>
      tpu.vector_store %arg11[%92, %c0_68], %91 {strides = array<i32>} : memref<8x128xf32, #tpu.memory_space<vmem>>, vector<1x128xf32>,
    }
    %c8_i32_31 = arith.constant 8 : i32
    %c0_i32_32 = arith.constant 0 : i32
    %c16_i32_33 = arith.constant 16 : i32
    %53 = arith.addi %c0_i32_32, %c16_i32_33 : i32
    %c1_i32_34 = arith.constant 1 : i32
    scf.for %arg13 = %c0_i32_32 to %53 step %c1_i32_34  : i32 {
      %c1_i32_62 = arith.constant 1 : i32
      %79 = arith.muli %arg13, %c1_i32_62 : i32
      %c0_i32_63 = arith.constant 0 : i32
      %80 = arith.addi %c0_i32_63, %79 : i32
      %81 = arith.index_cast %80 : i32 to index
      %82 = memref.load %arg8[%81] : memref<16xi32, #tpu.memory_space<smem>>
      %83 = arith.index_cast %82 : i32 to index
      %c0_64 = arith.constant 0 : index
      %84 = vector.load %arg11[%83, %c0_64] : memref<8x128xf32, #tpu.memory_space<vmem>>, vector<1x128xf32>
      %85 = arith.index_cast %80 : i32 to index
      %c0_65 = arith.constant 0 : index
      %86 = vector.load %arg12[%85, %c0_65] : memref<16x128xf32, #tpu.memory_space<vmem>>, vector<1x128xf32>
      tpu.vector_store %arg12[%85, %c0_65], %84 {strides = array<i32>} : memref<16x128xf32, #tpu.memory_space<vmem>>, vector<1x128xf32>,
    }
    %c16_i32_35 = arith.constant 16 : i32
    %c0_36 = arith.constant 0 : index
    %c0_37 = arith.constant 0 : index
    %54 = vector.load %arg12[%c0_36, %c0_37] : memref<16x128xf32, #tpu.memory_space<vmem>>, vector<16x128xf32>
    %55 = arith.subf %54, %51 : vector<16x128xf32>
    %56 = arith.truncf %55 : vector<16x128xf32> to vector<16x128xbf16>
    %cst_38 = arith.constant dense<0.000000e+00> : vector<16x128xf32>
    %57 = tpu.matmul %56, %0, %cst_38 {dimension_numbers = #tpu.dot_dimension_numbers<[1], [0], [0], [1], [0, 0, 1, 1], [], []>} : vector<16x128xbf16>, vector<128x128xbf16>, vector<16x128xf32> -> vector<16x128xf32>
    %58 = arith.addf %3, %57 : vector<16x128xf32>
    %cst_39 = arith.constant 0.000000e+00 : f32
    %59 = vector.broadcast %cst_39 : f32 to vector<16x128xf32>
    %60 = arith.maximumf %58, %59 : vector<16x128xf32>
    %c0_40 = arith.constant 0 : index
    %c0_41 = arith.constant 0 : index
    %61 = vector.load %arg10[%c0_40, %c0_41] : memref<16x128xf32, #tpu.memory_space<vmem>>, vector<16x128xf32>
    tpu.vector_store %arg10[%c0_40, %c0_41], %60 {strides = array<i32>} : memref<16x128xf32, #tpu.memory_space<vmem>>, vector<16x128xf32>,
    %c0_i32_42 = arith.constant 0 : i32
    %c8_i32_43 = arith.constant 8 : i32
    %62 = arith.addi %c0_i32_42, %c8_i32_43 : i32
    %c1_i32_44 = arith.constant 1 : i32
    scf.for %arg13 = %c0_i32_42 to %62 step %c1_i32_44  : i32 {
      %c1_i32_62 = arith.constant 1 : i32
      %79 = arith.muli %arg13, %c1_i32_62 : i32
      %c0_i32_63 = arith.constant 0 : i32
      %80 = arith.addi %c0_i32_63, %79 : i32
      %c2_i32_64 = arith.constant 2 : i32
      %81 = arith.muli %80, %c2_i32_64 : i32
      %82 = arith.index_cast %81 : i32 to index
      %83 = memref.load %arg7[%82] : memref<16xi32, #tpu.memory_space<smem>>
      %84 = arith.index_cast %83 : i32 to index
      %c0_65 = arith.constant 0 : index
      %85 = vector.load %arg10[%84, %c0_65] : memref<16x128xf32, #tpu.memory_space<vmem>>, vector<1x128xf32>
      %c1_i32_66 = arith.constant 1 : i32
      %86 = arith.addi %81, %c1_i32_66 : i32
      %87 = arith.index_cast %86 : i32 to index
      %88 = memref.load %arg7[%87] : memref<16xi32, #tpu.memory_space<smem>>
      %89 = arith.index_cast %88 : i32 to index
      %c0_67 = arith.constant 0 : index
      %90 = vector.load %arg10[%89, %c0_67] : memref<16x128xf32, #tpu.memory_space<vmem>>, vector<1x128xf32>
      %91 = arith.addf %85, %90 : vector<1x128xf32>
      %92 = arith.index_cast %80 : i32 to index
      %c0_68 = arith.constant 0 : index
      %93 = vector.load %arg11[%92, %c0_68] : memref<8x128xf32, #tpu.memory_space<vmem>>, vector<1x128xf32>
      tpu.vector_store %arg11[%92, %c0_68], %91 {strides = array<i32>} : memref<8x128xf32, #tpu.memory_space<vmem>>, vector<1x128xf32>,
    }
    %c8_i32_45 = arith.constant 8 : i32
    %c0_46 = arith.constant 0 : index
    %c0_47 = arith.constant 0 : index
    %63 = vector.load %arg11[%c0_46, %c0_47] : memref<8x128xf32, #tpu.memory_space<vmem>>, vector<8x128xf32>
    %cst_48 = arith.constant 5.000000e-01 : f32
    %64 = vector.broadcast %cst_48 : f32 to vector<8x128xf32>
    %65 = arith.mulf %63, %64 : vector<8x128xf32>
    %c0_49 = arith.constant 0 : index
    %c0_50 = arith.constant 0 : index
    %66 = vector.load %arg0[%c0_49, %c0_50] : memref<8x128xbf16, #tpu.memory_space<vmem>>, vector<8x128xbf16>
    %c0_51 = arith.constant 0 : index
    %c0_52 = arith.constant 0 : index
    %67 = vector.load %arg4[%c0_51, %c0_52] : memref<128x128xbf16, #tpu.memory_space<vmem>>, vector<128x128xbf16>
    %cst_53 = arith.constant dense<0.000000e+00> : vector<8x128xf32>
    %68 = tpu.matmul %66, %67, %cst_53 {dimension_numbers = #tpu.dot_dimension_numbers<[1], [0], [0], [1], [0, 0, 1, 1], [], []>} : vector<8x128xbf16>, vector<128x128xbf16>, vector<8x128xf32> -> vector<8x128xf32>
    %69 = arith.truncf %65 : vector<8x128xf32> to vector<8x128xbf16>
    %c0_54 = arith.constant 0 : index
    %c0_55 = arith.constant 0 : index
    %70 = vector.load %arg5[%c0_54, %c0_55] : memref<128x128xbf16, #tpu.memory_space<vmem>>, vector<128x128xbf16>
    %cst_56 = arith.constant dense<0.000000e+00> : vector<8x128xf32>
    %71 = tpu.matmul %69, %70, %cst_56 {dimension_numbers = #tpu.dot_dimension_numbers<[1], [0], [0], [1], [0, 0, 1, 1], [], []>} : vector<8x128xbf16>, vector<128x128xbf16>, vector<8x128xf32> -> vector<8x128xf32>
    %72 = arith.addf %68, %71 : vector<8x128xf32>
    %c0_57 = arith.constant 0 : index
    %c0_58 = arith.constant 0 : index
    %73 = vector.load %arg6[%c0_57, %c0_58] : memref<1x128xf32, #tpu.memory_space<vmem>>, vector<1x128xf32>
    %74 = vector.broadcast %73 : vector<1x128xf32> to vector<8x128xf32>
    %75 = arith.addf %72, %74 : vector<8x128xf32>
    %cst_59 = arith.constant 0.000000e+00 : f32
    %76 = vector.broadcast %cst_59 : f32 to vector<8x128xf32>
    %77 = arith.maximumf %75, %76 : vector<8x128xf32>
    %c0_60 = arith.constant 0 : index
    %c0_61 = arith.constant 0 : index
    %78 = vector.load %arg9[%c0_60, %c0_61] : memref<8x128xf32, #tpu.memory_space<vmem>>, vector<8x128xf32>
    tpu.vector_store %arg9[%c0_60, %c0_61], %77 {strides = array<i32>} : memref<8x128xf32, #tpu.memory_space<vmem>>, vector<8x128xf32>,
    return
  }
}

</mosaic_0001>

<bundles_post_ra>
// kernel: tpu_custom_call.1
= control target key start
LH: loop header
LB: loop body
LE: loop exit
PB: predicated region body
PF: predicated region fallthrough
CT: control target
= control target key end

     0   :  { %14 = vsyncpa [#allocation6], 0  ;;  %s1409_s0 = inlined_call_operand.hbm [shape: bf16[8,128], index: 0, kind: input, shape index: {}]   ;;  %s1410_s1 = inlined_call_operand.hbm [shape: bf16[16,128], index: 1, kind: input, shape index: {}]   ;;  %s1411_s2 = inlined_call_operand.hbm [shape: bf16[128,128], index: 2, kind: input, shape index: {}]   ;;  %s1412_s3 = inlined_call_operand.hbm [shape: bf16[128,128], index: 3, kind: input, shape index: {}]   ;;  %s1413_s4 = inlined_call_operand.hbm [shape: bf16[128,128], index: 4, kind: input, shape index: {}]   ;;  %s1414_s5 = inlined_call_operand.hbm [shape: bf16[128,128], index: 5, kind: input, shape index: {}]   ;;  %s1415_s6 = inlined_call_operand.vmem [shape: f32[1,128], index: 6, kind: input, shape index: {}]   ;;  %s1416_s7 = inlined_call_operand.vmem [shape: s32[16], index: 7, kind: input, shape index: {}]   ;;  %s1417_s8 = inlined_call_operand.vmem [shape: s32[16], index: 8, kind: input, shape index: {}]   ;;  %s1418_s9 = inlined_call_operand.hbm [shape: f32[8,128], index: 9, kind: output, shape index: {}]  }
   0x1   :  { %15 = vsyncpa [#allocation10], 0 }
   0x2   :  { %16 = vsyncpa [#allocation13], 0 }
   0x3   :  { %17 = vsyncpa [#allocation16], 0 }
   0x4   :  { %18 = vsyncpa [#allocation8], 0 }
   0x5   :  { %19 = vsyncpa [#allocation19], 0  ;;  %s36_s11 = sshll.u32 %s1410_s1, 4  ;;  %s37_s11 = int_to_ptr.hbm [resolvable:$true] %s36_s11 }
   0x6   :  { %20 = vsyncpa [#allocation7], 0  ;;  %s1189_s12 = smov [#allocation9]   ;;  %s62_s16 = sshll.u32 %s1412_s3, 4  ;;  %s63_s16 = int_to_ptr.hbm [resolvable:$true] %s62_s16 }
   0x7   :  { %s38_s13 = sshll.u32 %s1189_s12, 4  ;;  %s1190_s17 = smov 64   ;;  %s39_s13 = int_to_ptr.vmem [resolvable:$true] %s38_s13 }
   0x8   :  { %s1191_s18 = smov 4   ;;  %s1192_s19 = smov [#allocation12]  }
   0x9   :  { %44 = dma.hbm_to_vmem [thread:$0]  %s37_s11, 128, %s39_s13, [#allocation10], %s1190_s17, %s1190_s17, %s1191_s18  }
   0xa   :  { %s64_s20 = sshll.u32 %s1192_s19, 4  ;;  %s26_s22 = sshll.u32 %s1409_s0, 4  ;;  %s65_s20 = int_to_ptr.vmem [resolvable:$true] %s64_s20  ;;  %s27_s22 = int_to_ptr.hbm [resolvable:$true] %s26_s22 }
   0xb   :  { %70 = dma.hbm_to_vmem [thread:$0]  %s63_s16, 1024, %s65_s20, [#allocation13], %s1190_s17, %s1190_s17, %s1191_s18  }
   0xc   :  { %s49_s24 = sshll.u32 %s1411_s2, 4  ;;  %s1193_s25 = smov [#allocation5]   ;;  %s50_s24 = int_to_ptr.hbm [resolvable:$true] %s49_s24 }
   0xd   :  { %s28_s26 = sshll.u32 %s1193_s25, 4  ;;  %s1194_s27 = smov [#allocation11]   ;;  %s29_s26 = int_to_ptr.vmem [resolvable:$true] %s28_s26 }
   0xe   :  { %31 = dma.hbm_to_vmem [thread:$0]  %s27_s22, 64, %s29_s26, [#allocation6]  }
   0xf   :  { %s51_s28 = sshll.u32 %s1194_s27, 4  ;;  %s75_s0 = sshll.u32 %s1413_s4, 4  ;;  %s52_s28 = int_to_ptr.vmem [resolvable:$true] %s51_s28  ;;  %s76_s0 = int_to_ptr.hbm [resolvable:$true] %s75_s0 }
  0x10   :  { %57 = dma.hbm_to_vmem [thread:$0]  %s50_s24, 1024, %s52_s28, [#allocation10], %s1190_s17, %s1190_s17, %s1191_s18  }
  0x11   :  { %s88_s2 = sshll.u32 %s1414_s5, 4  ;;  %s1195_s12 = smov [#allocation14]   ;;  %s89_s2 = int_to_ptr.hbm [resolvable:$true] %s88_s2 }
  0x12   :  { %s77_s13 = sshll.u32 %s1195_s12, 4  ;;  %s1196_s14 = smov [#allocation15]   ;;  %s78_s13 = int_to_ptr.vmem [resolvable:$true] %s77_s13 }
  0x13   :  { %83 = dma.hbm_to_vmem [thread:$0]  %s76_s0, 1024, %s78_s13, [#allocation13], %s1190_s17, %s1190_s17, %s1191_s18  }
  0x14   :  { %s90_s4 = sshll.u32 %s1196_s14, 4  ;;  %s104_s19 = sshll.u32 %s1416_s7, 4  ;;  %s91_s4 = int_to_ptr.vmem [resolvable:$true] %s90_s4  ;;  %s105_s19 = int_to_ptr.vmem [resolvable:$true] %s104_s19 }
  0x15   :  { %96 = dma.hbm_to_vmem [thread:$0]  %s89_s2, 1024, %s91_s4, [#allocation16], %s1190_s17, %s1190_s17, %s1191_s18  }
  0x16   :  { %s113_s21 = sshll.u32 %s1417_s8, 4  ;;  %s1197_s1 = smov [#allocation17]   ;;  %s114_s21 = int_to_ptr.vmem [resolvable:$true] %s113_s21 }
  0x17   :  { %107 = dma.vmem_to_smem %s105_s19, 16, %s1197_s1, [#allocation8]  }
  0x18   :  { %s1198_s22 = smov [#allocation18]  }
  0x19   :  { %116 = dma.vmem_to_smem %s114_s21, 16, %s1198_s22, [#allocation19]  }
  0x1a   :  { %1155 = dma.done.wait [#allocation6], 64  }
  0x1b   :  { %1156 = vsyncadd [#allocation6], 4294967232 }
  0x1c   :  { %1157 = dma.done.wait [#allocation10], 1152  }
  0x1d   :  { %1158 = vsyncadd [#allocation10], 4294966144 }
  0x1e   :  { %1159 = dma.done.wait [#allocation13], 2048  }
  0x1f   :  { %1160 = vsyncadd [#allocation13], 4294965248 }
  0x20   :  { %1161 = dma.done.wait [#allocation16], 1024  }
  0x21   :  { %1162 = vsyncadd [#allocation16], 4294966272 }
  0x22   :  { %1163 = dma.done.wait [#allocation8], 16  }
  0x23   :  { %1164 = vsyncadd [#allocation8], 4294967280 }
  0x24   :  { %1165 = dma.done.wait [#allocation19], 16  }
  0x25   :  { %1166 = vsyncadd [#allocation19], 4294967280 }
  0x26   :  { %149 = sfence }
  0x27   :  { %v1289_v0 = vld [vmem:[#allocation12] sm:$0xf]  ;;  %v1291_v1 = vld [vmem:[#allocation12] sm:$0xf0]  ;;  %v1293_v2 = vld [vmem:[#allocation12 + $0x8] sm:$0xf]  ;;  %v256_v25 = vlaneseq }
  0x28   :  { %v1295_v3 = vld [vmem:[#allocation12 + $0x8] sm:$0xf0]  ;;  %v1297_v4 = vld [vmem:[#allocation12 + $0x10] sm:$0xf]  ;;  %v1299_v5 = vld [vmem:[#allocation12 + $0x10] sm:$0xf0] }
  0x29   :  { %v1301_v6 = vld [vmem:[#allocation12 + $0x18] sm:$0xf]  ;;  %v1303_v7 = vld [vmem:[#allocation12 + $0x18] sm:$0xf0]  ;;  %v1305_v8 = vld [vmem:[#allocation12 + $0x20] sm:$0xf] }
  0x2a   :  { %v1307_v9 = vld [vmem:[#allocation12 + $0x20] sm:$0xf0]  ;;  %v1309_v10 = vld [vmem:[#allocation12 + $0x28] sm:$0xf]  ;;  %v1311_v11 = vld [vmem:[#allocation12 + $0x28] sm:$0xf0] }
  0x2b   :  { %v1313_v12 = vld [vmem:[#allocation12 + $0x30] sm:$0xf]  ;;  %v1315_v13 = vld [vmem:[#allocation12 + $0x30] sm:$0xf0]  ;;  %v1317_v14 = vld [vmem:[#allocation12 + $0x38] sm:$0xf] }
  0x2c   :  { %v1319_v15 = vld [vmem:[#allocation12 + $0x38] sm:$0xf0]  ;;  %v873_v17 = vld [vmem:[#allocation11 + $0x30] sm:$0xff]  ;;  %v872_v18 = vld [vmem:[#allocation11 + $0x28] sm:$0xff]  ;;  %v257_v26 = vshrl.u32 %v256_v25, 7  ;;  %vm291_vm2 = vcmask 1040384  }
  0x2d   :  { %v874_v16 = vld [vmem:[#allocation11 + $0x38] sm:$0xff]  ;;  %v871_v19 = vld [vmem:[#allocation11 + $0x20] sm:$0xff]  ;;  %v869_v21 = vld [vmem:[#allocation11 + $0x10] sm:$0xff]  ;;  %vm297_vm3 = vcmask 1046528   ;;  %s1169_s7 = smov 0  }
  0x2e   :  { %238 = vmatpush.bf16.msra.mxu0 %v874_v16  ;;  %v870_v20 = vld [vmem:[#allocation11 + $0x18] sm:$0xff]  ;;  %v868_v22 = vld [vmem:[#allocation11 + $0x8] sm:$0xff]  ;;  %v867_v23 = vld [vmem:[#allocation11] sm:$0xff]  ;;  %v258_v29 = vadd.s32 8, %v257_v26  ;;  %v263_v30 = vand.u32 1, %v257_v26 }
  0x2f   :  { %v866_v24 = vld [vmem:[#allocation9] sm:$0xff] }
  0x30   :  { %v270_v31 = vand.u32 1, %v258_v29  ;;  %vm1327_vm0 = vcmp.eq.s32.totalorder %v263_v30, 1 }
  0x32   :  { %239 = vmatpush.bf16.msra.mxu0 %v873_v17  ;;  %vm1331_vm1 = vcmp.eq.s32.totalorder %v270_v31, 1 }
  0x36   :  { %240 = vmatpush.bf16.msra.mxu0 %v872_v18 }
  0x3a   :  { %241 = vmatpush.bf16.msra.mxu0 %v871_v19 }
  0x3e   :  { %242 = vmatpush.bf16.msra.mxu0 %v870_v20 }
  0x42   :  { %243 = vmatpush.bf16.msra.mxu0 %v869_v21 }
  0x46   :  { %244 = vmatpush.bf16.msra.mxu0 %v868_v22 }
  0x4a   :  { %245 = vmatpush.bf16.msra.mxu0 %v867_v23 }
  0x4d   :  { %246 = vmatmul.bf16.vlgmr.msra.gmra.mxu0 %v866_v24 }
  0xca   :  { %v1321_v27 = vpop.f32.mrf.mxu0 }
  0xcb   :  { %v252_v28 = vmax.f32 %v1321_v27, 0.0 }
  0xcd   :  { %254 = vst [vmem:[#allocation2] sm:$0xff] %v252_v28  ;;  %v292_v36 = vrot.slane %v252_v28, 7  ;;  %v298_v37 = vrot.slane %v252_v28, 1 }
  0xd2   :  { %v1324_v32 = vpop.f32.mrf.mxu0 }
  0xd3   :  { %v253_v33 = vmax.f32 %v1324_v32, 0.0 }
  0xd5   :  { %255 = vst [vmem:[#allocation2 + $0x8] sm:$0xff] %v253_v33  ;;  %v288_v38 = vrot.slane %v253_v33, 7  ;;  %v299_v39 = vrot.slane %v253_v33, 1 }
  0xd7   :  { %v293_v40 = vsel %vm291_vm2, %v292_v36, %v288_v38  ;;  %v296_v41 = vsel %vm291_vm2, %v288_v38, %v292_v36  ;;  %v300_v42 = vsel %vm297_vm3, %v298_v37, %v299_v39  ;;  %v304_v43 = vsel %vm297_vm3, %v299_v39, %v298_v37 }
  0xd8   :  { %v305_v44 = vsel %vm1327_vm0, %v300_v42, %v296_v41  ;;  %v306_v45 = vsel %vm1331_vm1, %v304_v43, %v293_v40 }
  0xd9 LB: > { %s759_s8 = sshll.u32 %s1171_s7, 1  ;;  %s322_s25 = scalar_lea.vmem [#allocation3], %s1171_s7  ;;  %s1171_s7 = sphi %s1169_s7, %s312_s7  }
  0xda   : > { %s314_s17 = sld [smem:[#allocation17 + %s759_s8]]  ;;  %s317_s18 = sadd.s32 1, %s759_s8 }
  0xdb   : > { %s318_s3 = sld [smem:[#allocation17 + %s317_s18]]  ;;  %s312_s7 = sadd.s32 1, %s1171_s7  }
  0xdc   : > { %p309_p0 = scmp.ge.s32.totalorder %s312_s7, 8  }
  0xdd   :  { %s1173_s26 = smov (%p309_p0), 0  }
  0xe0   : > { %s315_s23 = scalar_lea.vmem [#allocation2], %s314_s17 }
  0xe1   : > { %v316_v46 = vld [vmem:[%s315_s23] sm:$0x1]  ;;  %s319_s24 = scalar_lea.vmem [#allocation2], %s318_s3  ;;  %311 = sbr.rel (!%p309_p0) target bundleno = 217 (0xd9), region = 136 }
  0xe2   : > { %v320_v47 = vld [vmem:[%s319_s24] sm:$0x1] }
  0xe3   : > { %v321_v48 = vadd.f32 %v320_v47, %v316_v46 }
  0xe5   : > { %323 = vst [vmem:[%s322_s25] sm:$0x1] %v321_v48 }
  0xe6 LB: > { %s330_s27 = sld [smem:[#allocation18 + %s1175_s26]]  ;;  %s333_s29 = scalar_lea.vmem [#allocation4], %s1175_s26  ;;  %s1175_s26 = sphi %s1173_s26, %s329_s26  }
  0xe7   : > { %s329_s26 = sadd.s32 1, %s1175_s26  }
  0xe8   : > { %p326_p1 = scmp.ge.s32.totalorder %s329_s26, 16  }
  0xe9   :  { %v1345_v50 = vor.u32 (%p326_p1), %v1319_v15, %v1317_v14  ;;  %v1350_v51 = vor.u32 (%p326_p1), %v1315_v13, %v1313_v12  ;;  %v1355_v52 = vor.u32 (%p326_p1), %v1311_v11, %v1309_v10  ;;  %v1360_v53 = vor.u32 (%p326_p1), %v1307_v9, %v1305_v8  ;;  %s1177_s30 = smov (%p326_p1), 0  }
  0xea   :  { %328 = sbr.rel (!%p326_p1) target bundleno = 230 (0xe6), region = 147  ;;  %v1365_v54 = vor.u32 (%p326_p1), %v1303_v7, %v1301_v6  ;;  %v1370_v55 = vor.u32 (%p326_p1), %v1299_v5, %v1297_v4  ;;  %v1375_v56 = vor.u32 (%p326_p1), %v1295_v3, %v1293_v2  ;;  %v1380_v61 = vor.u32 (%p326_p1), %v1291_v1, %v1289_v0 }
  0xeb   :  { %388 = vmatpush.bf16.msra.mxu1 (%p326_p1), %v1345_v50 }
  0xec   : > { %s331_s28 = scalar_lea.vmem [#allocation3], %s330_s27 }
  0xed   : > { %v332_v49 = vld [vmem:[%s331_s28] sm:$0x1] }
  0xee   : > { %334 = vst [vmem:[%s333_s29] sm:$0x1] %v332_v49 }
  0xef   :  { %389 = vmatpush.bf16.msra.mxu1 %v1350_v51 }
  0xf3   :  { %390 = vmatpush.bf16.msra.mxu1 %v1355_v52 }
  0xf5   :  { %v335_v57 = vld [vmem:[#allocation4] sm:$0xff]  ;;  %v336_v58 = vld [vmem:[#allocation4 + $0x8] sm:$0xff] }
  0xf6   :  { %v337_v59 = vsub.f32 %v335_v57, %v305_v44  ;;  %v338_v60 = vsub.f32 %v336_v58, %v306_v45 }
  0xf7   :  { %391 = vmatpush.bf16.msra.mxu1 %v1360_v53 }
  0xf8   :  { %v339_v62 = vpack.c.bf16 %v338_v60, %v337_v59 }
  0xfb   :  { %392 = vmatpush.bf16.msra.mxu1 %v1365_v54 }
  0xff   :  { %393 = vmatpush.bf16.msra.mxu1 %v1370_v55 }
 0x103   :  { %394 = vmatpush.bf16.msra.mxu1 %v1375_v56 }
 0x107   :  { %395 = vmatpush.bf16.msra.mxu1 %v1380_v61 }
 0x10a   :  { %396 = vmatmul.bf16.vlgmr.msra.gmra.mxu1 %v339_v62 }
 0x187   :  { %v397_v63 = vpop.f32.mrf.mxu1 }
 0x188   :  { %v402_v4 = vadd.f32 %v397_v63, %v1321_v27 }
 0x18a   :  { %v404_v5 = vmax.f32 %v402_v4, 0.0 }
 0x18c   :  { %406 = vst [vmem:[#allocation2] sm:$0xff] %v404_v5  ;;  %v414_v7 = vrot.slane %v404_v5, 7  ;;  %v419_v8 = vrot.slane %v404_v5, 1 }
 0x18f   :  { %v399_v2 = vpop.f32.mrf.mxu1 }
 0x190   :  { %v403_v3 = vadd.f32 %v399_v2, %v1324_v32 }
 0x192   :  { %v405_v6 = vmax.f32 %v403_v3, 0.0 }
 0x194   :  { %407 = vst [vmem:[#allocation2 + $0x8] sm:$0xff] %v405_v6  ;;  %v411_v9 = vrot.slane %v405_v6, 7  ;;  %v420_v10 = vrot.slane %v405_v6, 1 }
 0x196   :  { %v415_v0 = vsel %vm291_vm2, %v414_v7, %v411_v9  ;;  %v418_v1 = vsel %vm291_vm2, %v411_v9, %v414_v7  ;;  %v421_v11 = vsel %vm297_vm3, %v419_v8, %v420_v10  ;;  %v425_v12 = vsel %vm297_vm3, %v420_v10, %v419_v8 }
 0x197   :  { %v426_v13 = vsel %vm1327_vm0, %v421_v11, %v418_v1  ;;  %v427_v14 = vsel %vm1331_vm1, %v425_v12, %v415_v0 }
 0x198 LB: > { %s792_s0 = sshll.u32 %s1179_s30, 1  ;;  %s443_s14 = scalar_lea.vmem [#allocation3], %s1179_s30  ;;  %s1179_s30 = sphi %s1177_s30, %s433_s30  }
 0x199   : > { %s435_s10 = sld [smem:[#allocation17 + %s792_s0]]  ;;  %s438_s11 = sadd.s32 1, %s792_s0 }
 0x19a   : > { %s439_s2 = sld [smem:[#allocation17 + %s438_s11]]  ;;  %s433_s30 = sadd.s32 1, %s1179_s30  }
 0x19b   : > { %p430_p2 = scmp.ge.s32.totalorder %s433_s30, 8  }
 0x19c   :  { %s1181_s4 = smov (%p430_p2), 0  }
 0x19f   : > { %s436_s12 = scalar_lea.vmem [#allocation2], %s435_s10 }
 0x1a0   : > { %v437_v15 = vld [vmem:[%s436_s12] sm:$0x1]  ;;  %s440_s13 = scalar_lea.vmem [#allocation2], %s439_s2  ;;  %432 = sbr.rel (!%p430_p2) target bundleno = 408 (0x198), region = 158 }
 0x1a1   : > { %v441_v16 = vld [vmem:[%s440_s13] sm:$0x1] }
 0x1a2   : > { %v442_v17 = vadd.f32 %v441_v16, %v437_v15 }
 0x1a4   : > { %444 = vst [vmem:[%s443_s14] sm:$0x1] %v442_v17 }
 0x1a5 LB: > { %s451_s15 = sld [smem:[#allocation18 + %s1183_s4]]  ;;  %s454_s19 = scalar_lea.vmem [#allocation4], %s1183_s4  ;;  %s1183_s4 = sphi %s1181_s4, %s450_s4  }
 0x1a6   : > { %s450_s4 = sadd.s32 1, %s1183_s4  }
 0x1a7   : > { %p447_p3 = scmp.ge.s32.totalorder %s450_s4, 16  }
 0x1a8   :  { %461 = vmatpush.bf16.msra.mxu2 (%p447_p3), %v1345_v50  ;;  %s1185_s5 = smov (%p447_p3), 0  }
 0x1a9   :  { %449 = sbr.rel (!%p447_p3) target bundleno = 421 (0x1a5), region = 169 }
 0x1ab   : > { %s452_s16 = scalar_lea.vmem [#allocation3], %s451_s15 }
 0x1ac   : > { %v453_v18 = vld [vmem:[%s452_s16] sm:$0x1]  ;;  %462 = vmatpush.bf16.msra.mxu2 (%p447_p3), %v1350_v51 }
 0x1ad   : > { %455 = vst [vmem:[%s454_s19] sm:$0x1] %v453_v18 }
 0x1b0   :  { %463 = vmatpush.bf16.msra.mxu2 %v1355_v52 }
 0x1b4   :  { %464 = vmatpush.bf16.msra.mxu2 %v1360_v53  ;;  %v456_v19 = vld [vmem:[#allocation4] sm:$0xff]  ;;  %v457_v20 = vld [vmem:[#allocation4 + $0x8] sm:$0xff] }
 0x1b5   :  { %v458_v21 = vsub.f32 %v456_v19, %v426_v13  ;;  %v459_v22 = vsub.f32 %v457_v20, %v427_v14 }
 0x1b7   :  { %v460_v23 = vpack.c.bf16 %v459_v22, %v458_v21 }
 0x1b8   :  { %465 = vmatpush.bf16.msra.mxu2 %v1365_v54 }
 0x1bc   :  { %466 = vmatpush.bf16.msra.mxu2 %v1370_v55 }
 0x1c0   :  { %467 = vmatpush.bf16.msra.mxu2 %v1375_v56 }
 0x1c4   :  { %468 = vmatpush.bf16.msra.mxu2 %v1380_v61 }
 0x1c7   :  { %469 = vmatmul.bf16.vlgmr.msra.gmra.mxu2 %v460_v23 }
 0x24a   :  { %v470_v24 = vpop.f32.mrf.mxu2 }
 0x24b   :  { %v475_v25 = vadd.f32 %v470_v24, %v1321_v27 }
 0x24d   :  { %v477_v26 = vmax.f32 %v475_v25, 0.0 }
 0x24f   :  { %479 = vst [vmem:[#allocation2] sm:$0xff] %v477_v26 }
 0x252   :  { %v472_v28 = vpop.f32.mrf.mxu2 }
 0x253   :  { %v476_v29 = vadd.f32 %v472_v28, %v1324_v32 }
 0x255   :  { %v478_v30 = vmax.f32 %v476_v29, 0.0 }
 0x257   :  { %480 = vst [vmem:[#allocation2 + $0x8] sm:$0xff] %v478_v30 }
 0x258 LB: > { %s793_s20 = sshll.u32 %s1187_s5, 1  ;;  %s496_s17 = scalar_lea.vmem [#allocation3], %s1187_s5  ;;  %s1187_s5 = sphi %s1185_s5, %s486_s5  }
 0x259   : > { %s488_s21 = sld [smem:[#allocation17 + %s793_s20]]  ;;  %s491_s1 = sadd.s32 1, %s793_s20 }
 0x25a   : > { %s492_s22 = sld [smem:[#allocation17 + %s491_s1]]  ;;  %s486_s5 = sadd.s32 1, %s1187_s5  }
 0x25b   : > { %p483_p4 = scmp.ge.s32.totalorder %s486_s5, 8  }
 0x25c   :  { %v890_v32 = vld [vmem:[#allocation15 + $0x38] sm:$0xff] (%p483_p4)  ;;  %v889_v35 = vld [vmem:[#allocation15 + $0x30] sm:$0xff] (%p483_p4)  ;;  %v888_v37 = vld [vmem:[#allocation15 + $0x28] sm:$0xff] (%p483_p4)  ;;  %s1199_s23 = smov (%p483_p4), [#allocation20]   ;;  %s670_s27 = sshll.u32 (%p483_p4), %s1418_s9, 4  ;;  %s671_s27 = int_to_ptr.hbm [resolvable:$true] %s670_s27 }
 0x25d   :  { %v882_v34 = vld [vmem:[#allocation14 + $0x38] sm:$0xff] (%p483_p4)  ;;  %582 = vmatpush.bf16.msra.mxu3 (%p483_p4), %v890_v32  ;;  %v881_v36 = vld [vmem:[#allocation14 + $0x30] sm:$0xff] (%p483_p4)  ;;  %v880_v38 = vld [vmem:[#allocation14 + $0x28] sm:$0xff] (%p483_p4)  ;;  %s668_s24 = sshll.u32 (%p483_p4), %s1199_s23, 4  ;;  %s669_s24 = int_to_ptr.vmem [resolvable:$true] %s668_s24 }
 0x25e   :  { %643 = vmatpush.bf16.msrb.mxu0 (%p483_p4), %v882_v34  ;;  %v887_v39 = vld [vmem:[#allocation15 + $0x20] sm:$0xff] (%p483_p4)  ;;  %v886_v41 = vld [vmem:[#allocation15 + $0x18] sm:$0xff] (%p483_p4)  ;;  %v885_v43 = vld [vmem:[#allocation15 + $0x10] sm:$0xff] (%p483_p4) }
 0x25f   : > { %s489_s7 = scalar_lea.vmem [#allocation2], %s488_s21  ;;  %v879_v40 = vld [vmem:[#allocation14 + $0x20] sm:$0xff] (%p483_p4)  ;;  %v878_v42 = vld [vmem:[#allocation14 + $0x18] sm:$0xff] (%p483_p4)  ;;  %v877_v44 = vld [vmem:[#allocation14 + $0x10] sm:$0xff] (%p483_p4) }
 0x260   : > { %v490_v31 = vld [vmem:[%s489_s7] sm:$0x1]  ;;  %s493_s8 = scalar_lea.vmem [#allocation2], %s492_s22  ;;  %485 = sbr.rel (!%p483_p4) target bundleno = 600 (0x258), region = 180  ;;  %v883_v49 = vld [vmem:[#allocation15] sm:$0xff] (%p483_p4) }
 0x261   : > { %v494_v33 = vld [vmem:[%s493_s8] sm:$0x1]  ;;  %583 = vmatpush.bf16.msra.mxu3 (%p483_p4), %v889_v35  ;;  %v875_v50 = vld [vmem:[#allocation14] sm:$0xff] (%p483_p4)  ;;  %v500_v52 = vld [vmem:[#allocation5] sm:$0xf] (%p483_p4) }
 0x262   : > { %v495_v27 = vadd.f32 %v494_v33, %v490_v31  ;;  %644 = vmatpush.bf16.msrb.mxu0 (%p483_p4), %v881_v36  ;;  %v884_v45 = vld [vmem:[#allocation15 + $0x8] sm:$0xff] (%p483_p4) }
 0x263   :  { %v876_v46 = vld [vmem:[#allocation14 + $0x8] sm:$0xff] (%p483_p4) }
 0x264   : > { %497 = vst [vmem:[%s496_s17] sm:$0x1] %v495_v27  ;;  %v942_v54 = vld [vmem:[%s1415_s6] ss:$0 sm:$0xff] (%p483_p4) }
 0x265   :  { %584 = vmatpush.bf16.msra.mxu3 %v888_v37 }
 0x266   :  { %645 = vmatpush.bf16.msrb.mxu0 %v880_v38 }
 0x269   :  { %585 = vmatpush.bf16.msra.mxu3 %v887_v39 }
 0x26a   :  { %646 = vmatpush.bf16.msrb.mxu0 %v879_v40 }
 0x26b   :  { %v498_v47 = vld [vmem:[#allocation3] sm:$0xff] }
 0x26c   :  { %v499_v48 = vmul.f32 0.5, %v498_v47 }
 0x26d   :  { %586 = vmatpush.bf16.msra.mxu3 %v886_v41 }
 0x26e   :  { %647 = vmatpush.bf16.msrb.mxu0 %v878_v42  ;;  %v517_v51 = vpack.c.bf16 %v499_v48, %v499_v48 }
 0x271   :  { %587 = vmatpush.bf16.msra.mxu3 %v885_v43 }
 0x272   :  { %648 = vmatpush.bf16.msrb.mxu0 %v877_v44 }
 0x275   :  { %588 = vmatpush.bf16.msra.mxu3 %v884_v45 }
 0x276   :  { %649 = vmatpush.bf16.msrb.mxu0 %v876_v46 }
 0x279   :  { %589 = vmatpush.bf16.msra.mxu3 %v883_v49 }
 0x27a   :  { %650 = vmatpush.bf16.msrb.mxu0 %v875_v50 }
 0x27c   :  { %590 = vmatmul.bf16.vlgmr.msra.gmra.mxu3 %v517_v51 }
 0x27d   :  { %651 = vmatmul.bf16.vlgmr.msrb.gmra.mxu0 %v500_v52 }
 0x2fa   :  { %v652_v53 = vpop.f32.mrf.mxu0 }
 0x2ff   :  { %v591_v55 = vpop.f32.mrf.mxu3 }
 0x300   :  { %v653_v56 = vadd.f32 %v652_v53, %v591_v55 }
 0x302   :  { %v654_v57 = vpop.f32.mrf.mxu0  ;;  %v660_v58 = vadd.f32 %v942_v54, %v653_v56 }
 0x304   :  { %v661_v59 = vmax.f32 %v660_v58, 0.0 }
 0x306   :  { %662 = vst [vmem:[#allocation20] sm:$0xff] %v661_v59 }
 0x307   :  { %v593_v60 = vpop.f32.mrf.mxu3  ;;  %673 = dma.vmem_to_hbm [thread:$0]  %s669_s24, 128, %s671_s27, [#allocation7]  }
 0x308   :  { %1167 = dma.done.wait [#allocation7], 128  }
 0x309   :  { %1168 = vsyncadd [#allocation7], 4294967168 }
 0x30a   :  { %678 = vsyncpa [#allocation6], 1 }
 0x30b   :  { %679 = vsyncpa [#allocation10], 1 }
 0x30c   :  { %680 = vsyncpa [#allocation13], 1 }
 0x30d   :  { %681 = vsyncpa [#allocation16], 1 }
 0x30e   :  { %682 = vsyncpa [#allocation7], 1 }
 0x30f   :  { %683 = vsyncpa [#allocation8], 1 }
 0x310   :  { %684 = vsyncpa [#allocation19], 1 }

</bundles_post_ra>
